<compile_context>
chip_gen: v6e
topology: v6e:2x2x1
jax: 0.10.0
libtpu: 0.0.40
codegen_flags: <defaults>
</compile_context>

<pallas_src>
import jax
import jax.numpy as jnp
from jax import lax
from jax.experimental import pallas as pl
from jax.experimental.pallas import tpu as pltpu


_LANES = 128
_SUBLANES = 8


def _round_down_mult(x, m):
    return (x // m) * m


def _sublane_mult(itemsize):
    """Packed second-minor tile height: 8 for f32, 16 for bf16, 32 for int8/fp8."""
    return max(_SUBLANES, 32 // max(1, itemsize))


def _vmem_limits():
    """Return (vmem_limit_bytes for the compiler, byte budget for tile sizing)."""
    try:
        info = pltpu.get_tpu_info()
        phys = int(getattr(info, "vmem_capacity_bytes", 0))
    except Exception:
        phys = 0
    if phys <= 0:
        phys = 64 * 1024 * 1024            # assume the smallest (v7x) if unknown
    limit = min(int(phys * 0.75), 100 * 1024 * 1024)   # ~48 MiB v7x, ~96 MiB v5e/v6e
    limit = max(limit, 16 * 1024 * 1024)
    tile_budget = int(limit * 0.85)        # headroom for compiler-internal scratch
    return limit, tile_budget


def _choose_tiles(K, R, C, in_item, out_item, budget, narrow_dtype):
    """Co-tune (TN, K_BLK).  TN is a multiple of the packed sublane height (or
    the full R when R is small); K_BLK <= K soaks up the remaining budget."""
    sub = _sublane_mult(in_item)
    if R <= sub:
        tn, tn_min = R, R                  # full dim is always a legal block
    else:
        # At most half of R so there are >= 2 parallel N tiles (v7x megacore),
        # capped so huge graphs still produce many tiles.
        tn = min(max(sub, _round_down_mult(R // 2, sub)), 2048)
        tn_min = sub

    while True:
        # Resident output (counted double-buffered to be safe) + f32 scratch.
        fixed = tn * C * 2 * out_item + (tn * C * 4 if narrow_dtype else 0)
        per_k = 2 * tn * C * in_item       # double-buffered input, per message
        k_cap = (budget - fixed) // per_k if budget > fixed else 0
        if k_cap >= 1 or tn <= tn_min:
            break
        tn = max(tn_min, _round_down_mult(tn // 2, sub))

    k_cap = int(max(1, min(K, k_cap)))
    if k_cap >= K:
        k_blk = K
    else:
        # Prefer an exact divisor of K close to the cap (no ragged tail);
        # otherwise take the cap and mask the tail block inside the kernel.
        k_blk = k_cap
        for t in range(k_cap, max(1, k_cap // 2) - 1, -1):
            if K % t == 0:
                k_blk = t
                break
    return tn, k_blk


def _partial_sum(m_ref, k, k_blk, k_total, mask_tail, acc_dtype):
    """Sum the (K_BLK, TN, C) block over axis 0, masking padded K rows if any."""
    x = m_ref[...]
    if mask_tail:
        rows = lax.broadcasted_iota(jnp.int32, (x.shape[0], 1, 1), 0)
        valid = (k * k_blk + rows) < k_total
        x = jnp.where(valid, x, jnp.zeros_like(x))
    return jnp.sum(x, axis=0, dtype=acc_dtype)


def _build_kernel(k_grid, k_blk, k_total, inv_k, resident_acc, mask_tail):
    """Return (kernel, needs_f32_scratch).  Grid = (n_tiles, k_blocks)."""
    acc_dtype = jnp.float32
    last = k_grid - 1

    if k_grid == 1:
        # Whole reduction folds into one step: sum, scale, cast, store.
        def kernel(m_ref, o_ref):
            s = _partial_sum(m_ref, 0, k_blk, k_total, False, acc_dtype)
            o_ref[...] = (s * inv_k).astype(o_ref.dtype)

        return kernel, False

    if resident_acc:
        # f32 output block is pinned across the K axis -> VMEM-resident; use it
        # directly as the accumulator.  1/K is folded into the last step.
        def kernel(m_ref, o_ref):
            k = pl.program_id(1)
            s = _partial_sum(m_ref, k, k_blk, k_total, mask_tail, acc_dtype)

            @pl.when(k == 0)
            def _():
                o_ref[...] = s

            @pl.when(jnp.logical_and(k > 0, k < last))
            def _():
                o_ref[...] += s

            @pl.when(k == last)
            def _():
                o_ref[...] = (o_ref[...] + s) * inv_k

        return kernel, False

    # Narrow input dtype: accumulate in an f32 scratch, cast once on finalize.
    def kernel(m_ref, o_ref, acc_ref):
        k = pl.program_id(1)
        s = _partial_sum(m_ref, k, k_blk, k_total, mask_tail, acc_dtype)

        @pl.when(k == 0)
        def _():
            acc_ref[...] = s

        @pl.when(jnp.logical_and(k > 0, k < last))
        def _():
            acc_ref[...] += s

        @pl.when(k == last)
        def _():
            o_ref[...] = ((acc_ref[...] + s) * inv_k).astype(o_ref.dtype)

    return kernel, True


def message_mean_agg(M, *, small_fallback_bytes=0):
    """Mean over axis 0 of M ([K, N, D] -> [N, D]) via a Pallas TPU kernel.

    small_fallback_bytes: if > 0 and M is smaller than this many bytes, use a
    plain XLA reduction (launch/pipeline overhead dwarfs the work for tiny
    inputs).  Disabled by default so the Pallas path is always exercised.
    """
    K, N, D = M.shape
    out_dtype = M.dtype
    in_item = jnp.dtype(M.dtype).itemsize
    out_item = in_item
    inv_k = 1.0 / float(K)                  # divide by the TRUE K

    if small_fallback_bytes and M.size * in_item < small_fallback_bytes:
        return (jnp.sum(M, axis=0, dtype=jnp.float32) * inv_k).astype(out_dtype)

    # Lane-dense view: if D is not a multiple of 128 but N*D is, fuse (N, D)
    # into (N*D/128, 128) so output stores stay unmasked. Pure view; the mean
    # over axis 0 is elementwise per position, so semantics are unchanged.
    if D % _LANES != 0 and (N * D) % _LANES == 0:
        R, C = (N * D) // _LANES, _LANES
    else:
        R, C = N, D
    M3 = M.reshape(K, R, C)

    narrow = out_dtype != jnp.float32
    vmem_limit, tile_budget = _vmem_limits()
    TN, K_BLK = _choose_tiles(K, R, C, in_item, out_item, tile_budget, narrow)

    n_grid = pl.cdiv(R, TN)
    k_grid = pl.cdiv(K, K_BLK)
    mask_tail = (K % K_BLK) != 0            # only possible when k_grid > 1

    resident_acc = not narrow
    kernel, needs_scratch = _build_kernel(
        k_grid, K_BLK, K, inv_k, resident_acc, mask_tail)
    scratch_shapes = [pltpu.VMEM((TN, C), jnp.float32)] if needs_scratch else []

    # Triple-buffer the input only if per-step slabs are small and several K
    # blocks stream through (keeps the HBM pipe full at v7x's 3.2 TB/s).
    slab_bytes = K_BLK * TN * C * in_item
    in_spec_kwargs = {}
    if k_grid >= 3 and slab_bytes < (1 << 20):
        in_spec_kwargs["pipeline_mode"] = pl.Buffered(3)
    in_spec = pl.BlockSpec((K_BLK, TN, C), lambda n, k: (k, n, 0),
                           **in_spec_kwargs)

    cost = pl.CostEstimate(
        flops=K * R * C,
        transcendentals=0,
        bytes_accessed=K * R * C * in_item + R * C * out_item,
    )

    out = pl.pallas_call(
        kernel,
        out_shape=jax.ShapeDtypeStruct((R, C), out_dtype),
        grid_spec=pltpu.PrefetchScalarGridSpec(
            num_scalar_prefetch=0,
            grid=(n_grid, k_grid),           # reduction (K) axis last
            in_specs=[in_spec],
            out_specs=pl.BlockSpec((TN, C), lambda n, k: (n, 0)),
            scratch_shapes=scratch_shapes,
        ),
        compiler_params=pltpu.CompilerParams(
            # N tiles are independent (megacore-shardable on v7x);
            # K is the carried reduction.
            dimension_semantics=("parallel", "arbitrary"),
            vmem_limit_bytes=vmem_limit,
        ),
        cost_estimate=cost,
    )(M3)
    return out.reshape(N, D)


if __name__ == "__main__":
    key = jax.random.PRNGKey(0)

    # Small shapes consistent with the module: K=8 messages, N=16 nodes,
    # D=128 features.  Whole K folds into a single grid step; N splits into
    # two parallel tiles.
    K, N, D = 8, 16, 128
    M = jax.random.normal(key, (K, N, D), dtype=jnp.float32)

    out = jax.block_until_ready(message_mean_agg(M))
    ref = jnp.sum(M, axis=0) / K
    assert out.shape == (N, D)
    assert out.dtype == M.dtype
    assert jnp.allclose(out, ref, atol=1e-5, rtol=1e-5), "f32 mismatch vs reference"

    # Narrow-dtype path (f32 accumulation inside the kernel, cast on store).
    Mb = jax.random.normal(jax.random.PRNGKey(1), (K, N, D), dtype=jnp.bfloat16)
    outb = jax.block_until_ready(message_mean_agg(Mb))
    refb = (jnp.sum(Mb.astype(jnp.float32), axis=0) / K).astype(jnp.bfloat16)
    assert outb.shape == (N, D) and outb.dtype == jnp.bfloat16
    assert jnp.allclose(outb.astype(jnp.float32), refb.astype(jnp.float32),
                        atol=1e-2, rtol=1e-2), "bf16 mismatch vs reference"

    print("KERNEL_OK")
</pallas_src>

<mosaic_0001>
module attributes {stable_mosaic.version = 11 : i64} {
  func.func @kernel(%arg0: i32, %arg1: i32, %arg2: memref<8x8x128xf32, #tpu.memory_space<vmem>>, %arg3: memref<8x128xf32, #tpu.memory_space<vmem>>) attributes {dimension_semantics = [#tpu.dimension_semantics<parallel>, #tpu.dimension_semantics<arbitrary>], iteration_bounds = array<i64: 2, 1>, scalar_prefetch = 0 : i64, scratch_operands = 0 : i64, tpu.core_type = #tpu.core_type<tc>, window_params = [{transform_indices = @transform_0, window_bounds = array<i64: 8, 8, 128>}, {transform_indices = @transform_1, window_bounds = array<i64: 8, 128>}]} {
    %c0 = arith.constant 0 : index
    %c0_0 = arith.constant 0 : index
    %c0_1 = arith.constant 0 : index
    %0 = vector.load %arg2[%c0, %c0_0, %c0_1] : memref<8x8x128xf32, #tpu.memory_space<vmem>>, vector<8x8x128xf32>
    %cst = arith.constant dense<0.000000e+00> : vector<8x128xf32>
    %1 = vector.multi_reduction <add>, %0, %cst [0] : vector<8x8x128xf32> to vector<8x128xf32>
    %cst_2 = arith.constant 1.250000e-01 : f32
    %2 = vector.broadcast %cst_2 : f32 to vector<8x128xf32>
    %3 = arith.mulf %1, %2 : vector<8x128xf32>
    %c0_3 = arith.constant 0 : index
    %c0_4 = arith.constant 0 : index
    %4 = vector.load %arg3[%c0_3, %c0_4] : memref<8x128xf32, #tpu.memory_space<vmem>>, vector<8x128xf32>
    tpu.vector_store %arg3[%c0_3, %c0_4], %3 {strides = array<i32>} : memref<8x128xf32, #tpu.memory_space<vmem>>, vector<8x128xf32>,
    return
  }
  func.func @transform_0(%arg0: i32, %arg1: i32) -> (i32, i32, i32) {
    %c0_i32 = arith.constant 0 : i32
    %c0_i32_0 = arith.constant 0 : i32
    return %arg1, %arg0, %c0_i32 : i32, i32, i32
  }
  func.func @transform_1(%arg0: i32, %arg1: i32) -> (i32, i32) {
    %c0_i32 = arith.constant 0 : i32
    %c0_i32_0 = arith.constant 0 : i32
    return %arg0, %c0_i32 : i32, i32
  }
}

</mosaic_0001>

<bundles_post_ra>
// kernel: tpu_custom_call.1
= control target key start
LH: loop header
LB: loop body
LE: loop exit
PB: predicated region body
PF: predicated region fallthrough
CT: control target
= control target key end

     0   :  { %6 = vsyncpa [#allocation3], 0  ;;  %s594_s0 = inlined_call_operand.hbm [shape: f32[8,16,128], index: 0, kind: input, shape index: {}]   ;;  %s595_s1 = inlined_call_operand.hbm [shape: f32[16,128], index: 1, kind: output, shape index: {}]  }
   0x1   :  { %8 = vsyncpa [#allocation3 + $0x1], 0 }
   0x2   :  { %9 = vsyncpa [#allocation4], 0 }
   0x3   :  { %11 = vsyncpa [#allocation4 + $0x1], 0  ;;  %s463_s6 = smov 0   ;;  %s465_s7 = smov 0  }
   0x4   :  { %s467_s8 = smov 0   ;;  %s469_s9 = smov 0  }
   0x5   :  { %s471_s10 = smov 0   ;;  %s473_s11 = smov 0  }
   0x6 LB: > { %s260_s12 = sadd.s32 4294967295, %s446_s11   ;;  %s261_s13 = sadd.s32 4294967294, %s446_s11   ;;  %s446_s11 = sphi %s473_s11, %s17_s11   ;;  %s442_s10 = sphi %s471_s10, %s606_s10   ;;  %s438_s9 = sphi %s469_s9, %s605_s9   ;;  %s434_s8 = sphi %s467_s8, %s604_s8   ;;  %s430_s7 = sphi %s465_s7, %s603_s7   ;;  %s426_s6 = sphi %s463_s6, %s602_s6  }
   0x7   : > { %s29_s14 = sadd.s32 1, %s442_s10  ;;  %s38_s15 = sadd.s32 1, %s434_s8 }
   0x8   : > { %p31_p0 = scmp.ge.s32.totalorder %s29_s14, 2  ;;  %p45_p1 = scmp.ne.s32.totalorder %s434_s8, %s430_s7 }
   0x9   : > { %p46_p2 = scmp.eq.s32.totalorder %s446_s11, 0  ;;  %p51_p3 = scmp.ne.s32.totalorder %s430_s7, %s426_s6 }
   0xa   : > { %s608_s14 = smov (%p31_p0, %s29_s14), 0  ;;  %p52_p5 = scmp.eq.s32.totalorder %s260_s12, 0 }
   0xb   : > { %p504_p4 = por %p46_p2, %p45_p1  ;;  %s34_s17 = ssub.s32 %s442_s10, %s608_s14 }
   0xc   : > { %p75_p6 = scmp.eq.s32.totalorder %s260_s12, 1  ;;  %p36_p7 = scmp.eq.s32.totalorder %s34_s17, 0 }
   0xd   : > { %p510_p8 = por %p52_p5, %p51_p3  ;;  %p81_p10 = scmp.eq.s32.totalorder %s261_s13, 1 }
   0xe   : > { %p514_p9 = por %p75_p6, %p45_p1  ;;  %p285_p13 = scmp.lt.s32.totalorder %s446_s11, 2 }
   0xf   : > { %s519_s20 = scalar_select %p36_p7, %s434_s8, %s38_s15  }
  0x10   : > { %p521_p11 = por %p81_p10, %p51_p3  ;;  %s101_s22 = sand.u32 1, %s434_s8  }
  0x11   : > { %s264_s23 = sshll.u32 %s101_s22, 6  ;;  %s265_s24 = sshll.u32 %s442_s10, 7 }
  0x12   : > { %s113_s27 = scalar_lea.hbm %s594_s0, %s265_s24  ;;  %s105_s28 = scalar_lea.vmem [#allocation2], %s264_s23 }
  0x13   : > { %s114_s29 = sshll.u32 %s105_s28, 4  ;;  %p534_p0 = pnand %p285_p13, %p504_p4  ;;  %s115_s29 = int_to_ptr.vmem [resolvable:$true] %s114_s29 }
  0x14   : > { %s102_s2 = scalar_lea.sflag [#allocation3], %s101_s22  ;;  %s351_s3 = scalar_lea.vmem %s115_s29, 1024 }
  0x15   : > { %p340_p1 = pneg %p534_p0  ;;  %p352_p2 = scmp.ne.s32.totalorder %s115_s29, %s351_s3 }
  0x16   : > { %s448_s4 = smov [#allocation2]  }
  0x17   : > { %p354_p3 = pnand %p352_p2, %p340_p1  ;;  %s356_s5 = sshll.u32 %s448_s4, 4  ;;  %s357_s5 = int_to_ptr.vmem [resolvable:$false] %s356_s5 }
  0x18   : > { %s358_s12 = scalar_lea.vmem %s357_s5, 2048  ;;  %p359_p6 = scmp.lt.s32.totalorder %s115_s29, %s357_s5 }
  0x19   : > { %p355_p5 = pneg %p354_p3  ;;  %p360_p7 = scmp.lt.s32.totalorder %s358_s12, %s351_s3 }
  0x1b   : > { %p361_p10 = por %p360_p7, %p359_p6 }
  0x1d   : > { %p362_p12 = pnand %p361_p10, %p355_p5 }
  0x1f   : > { %365 = shalt.err (!%p362_p12)
}
  0x20   : > { %s449_s13 = smov 256   ;;  %s450_s15 = smov 128  }
  0x21   : > { %s451_s16 = smov 8   ;;  %p266_p4 = scmp.ge.s32.totalorder %s446_s11, 1 }
  0x22   : > { %280 = dma.hbm_to_vmem [thread:$0]  (!%p534_p0), %s113_s27, 1024, %s115_s29, %s102_s2, %s449_s13, %s450_s15, %s451_s16  }
  0x23   : > { %p122_p13 = scmp.lt.s32.totalorder %s446_s11, 3 }
  0x25   : > { %p123_p1 = pnand %p266_p4, %p122_p13 }
  0x26   : > { %s545_s17 = sand.u32 (!%p123_p1), 1, %s430_s7  }
  0x27   : > { %126 = sbr.rel (%p123_p1) target bundleno = 75 (0x4b), region = 24  ;;  %s267_s22 = sshll.u32 (!%p123_p1), %s545_s17, 6 }
  0x28   : > { %s129_s23 = scalar_lea.sflag (!%p123_p1), [#allocation3], %s545_s17  ;;  %s132_s24 = scalar_lea.vmem (!%p123_p1), [#allocation2], %s267_s22 }
  0x2c   : > { %417 = dma.done.wait (%p510_p8), %s129_s23, 1024  }
  0x2d   : > { %419 = vsyncadd (%p510_p8), %s129_s23, 4294966272  ;;  %v152_v0 = vld [vmem:[%s132_s24] sm:$0xff]  ;;  %v153_v1 = vld [vmem:[%s132_s24 + $0x8] sm:$0xff]  ;;  %s268_s25 = sshll.u32 %s545_s17, 3  ;;  %s270_s27 = sshll.u32 %s438_s9, 7 }
  0x2e   : > { %v154_v2 = vld [vmem:[%s132_s24 + $0x10] sm:$0xff]  ;;  %v160_v3 = vadd.f32 %v153_v1, %v152_v0  ;;  %v155_v4 = vld [vmem:[%s132_s24 + $0x18] sm:$0xff]  ;;  %v156_v6 = vld [vmem:[%s132_s24 + $0x20] sm:$0xff]  ;;  %s150_s18 = scalar_lea.vmem [#allocation5], %s268_s25  ;;  %s181_s30 = scalar_lea.hbm %s595_s1, %s270_s27 }
  0x2f   : > { %v157_v8 = vld [vmem:[%s132_s24 + $0x28] sm:$0xff]  ;;  %v158_v10 = vld [vmem:[%s132_s24 + $0x30] sm:$0xff]  ;;  %v159_v12 = vld [vmem:[%s132_s24 + $0x38] sm:$0xff]  ;;  %s183_s26 = sshll.u32 %s150_s18, 4  ;;  %s170_s2 = scalar_lea.sflag [#allocation4], %s545_s17  ;;  %s184_s26 = int_to_ptr.vmem [resolvable:$true] %s183_s26 }
  0x30   : > { %v161_v5 = vadd.f32 %v160_v3, %v154_v2  ;;  %s366_s3 = scalar_lea.vmem %s184_s26, 128  ;;  %s452_s4 = smov [#allocation5]  }
  0x31   : > { %p367_p8 = scmp.ne.s32.totalorder %s184_s26, %s366_s3  ;;  %s370_s5 = sshll.u32 %s452_s4, 4  ;;  %s371_s5 = int_to_ptr.vmem [resolvable:$false] %s370_s5 }
  0x32   : > { %v162_v7 = vadd.f32 %v161_v5, %v155_v4  ;;  %s372_s12 = scalar_lea.vmem %s371_s5, 256  ;;  %p373_p2 = scmp.lt.s32.totalorder %s184_s26, %s371_s5 }
  0x33   : > { %p368_p12 = pnand %p367_p8, %p514_p9  ;;  %p374_p3 = scmp.lt.s32.totalorder %s372_s12, %s366_s3 }
  0x34   : > { %v163_v9 = vadd.f32 %v162_v7, %v156_v6 }
  0x35   : > { %p369_p0 = pneg %p368_p12  ;;  %p375_p5 = por %p374_p3, %p373_p2 }
  0x36   : > { %v164_v11 = vadd.f32 %v163_v9, %v157_v8 }
  0x37   : > { %p376_p6 = pnand %p375_p5, %p369_p0 }
  0x38   : > { %v165_v13 = vadd.f32 %v164_v11, %v158_v10 }
  0x3a   : > { %v166_v14 = vadd.f32 %v165_v13, %v159_v12 }
  0x3c   : > { %v167_v15 = vmul.f32 0.125, %v166_v14 }
  0x3e   : > { %168 = vst [vmem:[%s150_s18] sm:$0xff] %v167_v15 }
  0x3f   : > { %379 = shalt.err (!%p376_p6)
}
  0x40   : > { %s380_s9 = scalar_lea.hbm %s181_s30, 128  ;;  %s384_s16 = scalar_lea.hbm %s595_s1, 256 }
  0x41   : > { %p381_p7 = scmp.ne.s32.totalorder %s181_s30, %s380_s9  ;;  %p385_p13 = scmp.lt.s32.totalorder %s181_s30, %s595_s1 }
  0x42   : > { %p386_p1 = scmp.lt.s32.totalorder %s384_s16, %s380_s9 }
  0x43   : > { %p382_p10 = pnand %p381_p7, %p514_p9 }
  0x44   : > { %p387_p8 = por %p386_p1, %p385_p13 }
  0x45   : > { %p383_p4 = pneg %p382_p10 }
  0x47   : > { %p388_p12 = pnand %p387_p8, %p383_p4 }
  0x49   : > { %391 = shalt.err (!%p388_p12)
}
  0x4a   : > { %275 = dma.vmem_to_hbm [thread:$0]  (%p514_p9), %s184_s26, 128, %s181_s30, %s170_s2  }
  0x4b PF: > { %s195_s23 = sand.u32 1, %s426_s6   ;;  %p601_p0 = scmp.ge.s32.totalorder %s446_s11, 2 }
  0x4c   : > { %s196_s24 = scalar_lea.sflag [#allocation4], %s195_s23 }
  0x4d   : > { %p282_p2 = pnand %p601_p0, %p521_p11 }
  0x4f   : > { %p283_p3 = pneg %p282_p2 }
  0x51   : > { %421 = dma.done.wait (%p283_p3), %s196_s24, 128  }
  0x52   : > { %423 = vsyncadd (%p283_p3), %s196_s24, 4294967168  ;;  %s17_s11 = sadd.s32 1, %s446_s11   ;;  %s602_s6 = smov %s430_s7 }
  0x53   : > { %p14_p5 = scmp.ge.s32.totalorder %s17_s11, 4   ;;  %s603_s7 = smov %s434_s8 }
  0x54   : > { %s604_s8 = smov %s519_s20  ;;  %s605_s9 = smov %s442_s10 }
  0x55   : > { %s606_s10 = smov %s608_s14  ;;  %16 = sbr.rel (!%p14_p5) target bundleno = 6 (0x6), region = 69 }
  0x5a   :  { %201 = vsyncpa [#allocation3], 1 }
  0x5b   :  { %203 = vsyncpa [#allocation3 + $0x1], 1 }
  0x5c   :  { %204 = vsyncpa [#allocation4], 1 }
  0x5d   :  { %206 = vsyncpa [#allocation4 + $0x1], 1 }

</bundles_post_ra>
